<compile_context>
chip_gen: v7x
topology: tpu7x:2x2x1
jax: 0.10.0
libtpu: 0.0.40
codegen_flags: <defaults>
</compile_context>

<pallas_src>
import jax
import jax.numpy as jnp
from jax.experimental import pallas as pl
from jax.experimental.pallas import tpu as pltpu


def _round_up(x, m):
    return (x + m - 1) // m * m


def _cls_head_kernel(x_ref, w1_ref, b1_ref, w2_ref, b2_ref, o_ref):
    # x_ref:  (tb, H)      CLS-token features tile (native dtype -> MXU)
    # w1_ref: (H, H)       dense weight, (in, out) layout, VMEM-resident
    # b1_ref: (1, H)       dense bias
    # w2_ref: (H, L_pad)   out_proj weight, (in, out) layout, zero-padded cols
    # b2_ref: (1, L_pad)   out_proj bias, zero-padded
    # o_ref:  (tb, L_pad)  logits tile (lane-dense, unmasked stores)
    x = x_ref[...]
    h = jnp.dot(x, w1_ref[...], preferred_element_type=jnp.float32)
    h = jnp.tanh(h + b1_ref[...].astype(jnp.float32))      # f32 elementwise
    h = h.astype(w2_ref.dtype)                              # single downcast
    out = jnp.dot(h, w2_ref[...], preferred_element_type=jnp.float32)
    out = out + b2_ref[...].astype(jnp.float32)
    o_ref[...] = out.astype(o_ref.dtype)


def prepare_head_params(dense_w, dense_b, out_w, out_b, *, lane=128):
    """One-time (model-load) parameter prep.

    Transposes nn.Linear weights from torch (out_features, in_features) layout
    to (in_features, out_features) and zero-pads the num_labels axis up to a
    multiple of 128 lanes. Do NOT call per forward pass.
    """
    H = dense_w.shape[0]
    L = out_w.shape[0]
    L_pad = _round_up(L, lane)
    w1 = jnp.asarray(dense_w).T                                   # (H, H)
    b1 = jnp.asarray(dense_b).reshape(1, H)                       # (1, H)
    w2 = jnp.zeros((H, L_pad), out_w.dtype).at[:, :L].set(jnp.asarray(out_w).T)
    b2 = jnp.zeros((1, L_pad), out_b.dtype).at[0, :L].set(jnp.asarray(out_b))
    return (w1, b1, w2, b2, L)


def roberta_classification_head(features, prepared_params, *, tb_max=128):
    """features: (B, S, H). prepared_params: output of prepare_head_params."""
    w1, b1, w2, b2, L = prepared_params
    B, S, H = features.shape
    L_pad = w2.shape[1]

    # CLS-token slice. Kept in the wrapper: a tiny strided gather of B*H
    # elements; dominant HBM traffic here is the VMEM-resident HxH weight.
    x = features[:, 0, :]                                          # (B, H)

    # Batch tiling: rows padded to a sublane multiple of 8, tile <= 128.
    tb = min(tb_max, _round_up(B, 8))
    B_pad = _round_up(B, tb)
    if B_pad != B:
        x = jnp.pad(x, ((0, B_pad - B), (0, 0)))

    itemsize = jnp.dtype(w1.dtype).itemsize
    act_itemsize = jnp.dtype(x.dtype).itemsize
    cost = pl.CostEstimate(
        flops=2 * B_pad * H * H + 2 * B_pad * H * L_pad,
        transcendentals=B_pad * H,
        bytes_accessed=(
            (H * H + H * L_pad + H + L_pad) * itemsize
            + (B_pad * H + B_pad * L_pad) * act_itemsize
        ),
    )

    out = pl.pallas_call(
        _cls_head_kernel,
        out_shape=jax.ShapeDtypeStruct((B_pad, L_pad), features.dtype),
        grid=(B_pad // tb,),
        in_specs=[
            pl.BlockSpec((tb, H), lambda i: (i, 0)),       # x: streamed per tile
            pl.BlockSpec((H, H), lambda i: (0, 0)),        # w1: VMEM-resident
            pl.BlockSpec((1, H), lambda i: (0, 0)),        # b1: VMEM-resident
            pl.BlockSpec((H, L_pad), lambda i: (0, 0)),    # w2: VMEM-resident
            pl.BlockSpec((1, L_pad), lambda i: (0, 0)),    # b2: VMEM-resident
        ],
        out_specs=pl.BlockSpec((tb, L_pad), lambda i: (i, 0)),
        compiler_params=pltpu.CompilerParams(
            dimension_semantics=("parallel",),
        ),
        cost_estimate=cost,
    )(x, w1, b1, w2, b2)

    return out[:B, :L]


if __name__ == "__main__":
    # Small shapes consistent with the module: batch=2, seq=8, hidden=32, labels=4
    B, S, H, L = 2, 8, 32, 4

    key = jax.random.PRNGKey(0)
    k_feat, k_w1, k_b1, k_w2, k_b2 = jax.random.split(key, 5)

    features = jax.random.normal(k_feat, (B, S, H), dtype=jnp.float32)
    # torch nn.Linear layout: (out_features, in_features)
    dense_w = jax.random.normal(k_w1, (H, H), dtype=jnp.float32) * 0.02
    dense_b = jax.random.normal(k_b1, (H,), dtype=jnp.float32) * 0.02
    out_w = jax.random.normal(k_w2, (L, H), dtype=jnp.float32) * 0.02
    out_b = jax.random.normal(k_b2, (L,), dtype=jnp.float32) * 0.02

    # One-time parameter prep (model-load time), then the hot-path call.
    params = prepare_head_params(dense_w, dense_b, out_w, out_b)
    logits = roberta_classification_head(features, params)
    logits = jax.block_until_ready(logits)

    # Reference check in plain JAX (same math, eval-mode dropout = identity).
    x = features[:, 0, :]
    ref = jnp.tanh(x @ dense_w.T + dense_b) @ out_w.T + out_b
    assert logits.shape == (B, L)
    assert jnp.allclose(logits, ref, atol=1e-5, rtol=1e-5)

    print("KERNEL_OK")
</pallas_src>

<mosaic_0001>
module attributes {stable_mosaic.version = 11 : i64} {
  func.func @_cls_head_kernel(%arg0: i32, %arg1: memref<8x32xf32, #tpu.memory_space<vmem>>, %arg2: memref<32x32xf32, #tpu.memory_space<vmem>>, %arg3: memref<1x32xf32, #tpu.memory_space<vmem>>, %arg4: memref<32x128xf32, #tpu.memory_space<vmem>>, %arg5: memref<1x128xf32, #tpu.memory_space<vmem>>, %arg6: memref<8x128xf32, #tpu.memory_space<vmem>>) attributes {dimension_semantics = [#tpu.dimension_semantics<parallel>], iteration_bounds = array<i64: 1>, scalar_prefetch = 0 : i64, scratch_operands = 0 : i64, tpu.core_type = #tpu.core_type<tc>, window_params = [{transform_indices = @transform_0, window_bounds = array<i64: 8, 32>}, {pipeline_mode = #tpu.pipeline_mode<synchronous>, transform_indices = @transform_1, window_bounds = array<i64: 32, 32>}, {pipeline_mode = #tpu.pipeline_mode<synchronous>, transform_indices = @transform_2, window_bounds = array<i64: 1, 32>}, {pipeline_mode = #tpu.pipeline_mode<synchronous>, transform_indices = @transform_3, window_bounds = array<i64: 32, 128>}, {pipeline_mode = #tpu.pipeline_mode<synchronous>, transform_indices = @transform_4, window_bounds = array<i64: 1, 128>}, {transform_indices = @transform_5, window_bounds = array<i64: 8, 128>}]} {
    %c0 = arith.constant 0 : index
    %c0_0 = arith.constant 0 : index
    %0 = vector.load %arg1[%c0, %c0_0] : memref<8x32xf32, #tpu.memory_space<vmem>>, vector<8x32xf32>
    %c0_1 = arith.constant 0 : index
    %c0_2 = arith.constant 0 : index
    %1 = vector.load %arg2[%c0_1, %c0_2] : memref<32x32xf32, #tpu.memory_space<vmem>>, vector<32x32xf32>
    %cst = arith.constant dense<0.000000e+00> : vector<8x32xf32>
    %2 = tpu.matmul %0, %1, %cst {dimension_numbers = #tpu.dot_dimension_numbers<[1], [0], [0], [1], [0, 0, 1, 1], [], []>} : vector<8x32xf32>, vector<32x32xf32>, vector<8x32xf32> -> vector<8x32xf32>
    %c0_3 = arith.constant 0 : index
    %c0_4 = arith.constant 0 : index
    %3 = vector.load %arg3[%c0_3, %c0_4] : memref<1x32xf32, #tpu.memory_space<vmem>>, vector<1x32xf32>
    %4 = vector.broadcast %3 : vector<1x32xf32> to vector<8x32xf32>
    %5 = arith.addf %2, %4 : vector<8x32xf32>
    %6 = math.tanh %5 : vector<8x32xf32>
    %c0_5 = arith.constant 0 : index
    %c0_6 = arith.constant 0 : index
    %7 = vector.load %arg4[%c0_5, %c0_6] : memref<32x128xf32, #tpu.memory_space<vmem>>, vector<32x128xf32>
    %cst_7 = arith.constant dense<0.000000e+00> : vector<8x128xf32>
    %8 = tpu.matmul %6, %7, %cst_7 {dimension_numbers = #tpu.dot_dimension_numbers<[1], [0], [0], [1], [0, 0, 1, 1], [], []>} : vector<8x32xf32>, vector<32x128xf32>, vector<8x128xf32> -> vector<8x128xf32>
    %c0_8 = arith.constant 0 : index
    %c0_9 = arith.constant 0 : index
    %9 = vector.load %arg5[%c0_8, %c0_9] : memref<1x128xf32, #tpu.memory_space<vmem>>, vector<1x128xf32>
    %10 = vector.broadcast %9 : vector<1x128xf32> to vector<8x128xf32>
    %11 = arith.addf %8, %10 : vector<8x128xf32>
    %c0_10 = arith.constant 0 : index
    %c0_11 = arith.constant 0 : index
    %12 = vector.load %arg6[%c0_10, %c0_11] : memref<8x128xf32, #tpu.memory_space<vmem>>, vector<8x128xf32>
    tpu.vector_store %arg6[%c0_10, %c0_11], %11 {strides = array<i32>} : memref<8x128xf32, #tpu.memory_space<vmem>>, vector<8x128xf32>,
    return
  }
  func.func @transform_0(%arg0: i32) -> (i32, i32) {
    %c0_i32 = arith.constant 0 : i32
    %c0_i32_0 = arith.constant 0 : i32
    return %arg0, %c0_i32 : i32, i32
  }
  func.func @transform_1(%arg0: i32) -> (i32, i32) {
    %c0_i32 = arith.constant 0 : i32
    %c0_i32_0 = arith.constant 0 : i32
    %c0_i32_1 = arith.constant 0 : i32
    return %c0_i32, %c0_i32_0 : i32, i32
  }
  func.func @transform_2(%arg0: i32) -> (i32, i32) {
    %c0_i32 = arith.constant 0 : i32
    %c0_i32_0 = arith.constant 0 : i32
    %c0_i32_1 = arith.constant 0 : i32
    return %c0_i32, %c0_i32_0 : i32, i32
  }
  func.func @transform_3(%arg0: i32) -> (i32, i32) {
    %c0_i32 = arith.constant 0 : i32
    %c0_i32_0 = arith.constant 0 : i32
    %c0_i32_1 = arith.constant 0 : i32
    return %c0_i32, %c0_i32_0 : i32, i32
  }
  func.func @transform_4(%arg0: i32) -> (i32, i32) {
    %c0_i32 = arith.constant 0 : i32
    %c0_i32_0 = arith.constant 0 : i32
    %c0_i32_1 = arith.constant 0 : i32
    return %c0_i32, %c0_i32_0 : i32, i32
  }
  func.func @transform_5(%arg0: i32) -> (i32, i32) {
    %c0_i32 = arith.constant 0 : i32
    %c0_i32_0 = arith.constant 0 : i32
    return %arg0, %c0_i32 : i32, i32
  }
}

</mosaic_0001>

<bundles_post_ra>
// kernel: tpu_custom_call.1
= control target key start
LH: loop header
LB: loop body
LE: loop exit
PB: predicated region body
PF: predicated region fallthrough
CT: control target
= control target key end

     0   :  { %10 = vsyncpa [#allocation3], 0  ;;  %s502_s0 = inlined_call_operand.hbm [shape: f32[8,32], index: 0, kind: input, shape index: {}]   ;;  %s503_s1 = inlined_call_operand.hbm [shape: f32[32,32], index: 1, kind: input, shape index: {}]   ;;  %s504_s2 = inlined_call_operand.vmem [shape: f32[1,32], index: 2, kind: input, shape index: {}]   ;;  %s505_s3 = inlined_call_operand.hbm [shape: f32[32,128], index: 3, kind: input, shape index: {}]   ;;  %s506_s4 = inlined_call_operand.vmem [shape: f32[1,128], index: 4, kind: input, shape index: {}]   ;;  %s507_s5 = inlined_call_operand.hbm [shape: f32[8,128], index: 5, kind: output, shape index: {}]  }
   0x1   :  { %11 = vsyncpa [#allocation6], 0 }
   0x2   :  { %12 = vsyncpa [#allocation4], 0  ;;  %s401_s18 = smov [#allocation5]   ;;  %s307_s22 = scalar_lea.hbm %s503_s1, 512 }
   0x3   :  { %s28_s19 = sshll.u32 %s401_s18, 4  ;;  %p308_p0 = scmp.ne.s32.totalorder %s503_s1, %s307_s22  ;;  %s29_s19 = int_to_ptr.vmem [resolvable:$true] %s28_s19 }
   0x4   :  { %p311_p1 = scmp.lt.u32.totalorder %s307_s22, %s503_s1 }
   0x6   :  { %p313_p2 = pnand %p311_p1, %p308_p0 }
   0x8   :  { %316 = shalt.err (!%p313_p2)
}
   0x9   :  { %s317_s27 = scalar_lea.vmem %s29_s19, 512  ;;  %p322_p4 = scmp.lt.s32.totalorder %s29_s19, %s29_s19 }
   0xa   :  { %p318_p3 = scmp.ne.s32.totalorder %s29_s19, %s317_s27  ;;  %p323_p5 = scmp.lt.s32.totalorder %s317_s27, %s317_s27 }
   0xc   :  { %p324_p6 = por %p323_p5, %p322_p4 }
   0xe   :  { %p325_p7 = pnand %p324_p6, %p318_p3 }
  0x10   :  { %328 = shalt.err (!%p325_p7)
}
  0x11   :  { %s402_s28 = smov 128   ;;  %s403_s29 = smov 8  }
  0x12   :  { %34 = dma.hbm_to_vmem [thread:$0]  %s503_s1, 512, %s29_s19, [#allocation6], %s402_s28, %s402_s28, %s403_s29  }
  0x13   :  { %s404_s7 = smov [#allocation2]   ;;  %s405_s9 = smov [#allocation7]  }
  0x14   :  { %s19_s8 = sshll.u32 %s404_s7, 4  ;;  %s42_s10 = sshll.u32 %s405_s9, 4  ;;  %s20_s8 = int_to_ptr.vmem [resolvable:$true] %s19_s8  ;;  %s43_s10 = int_to_ptr.vmem [resolvable:$true] %s42_s10 }
  0x15   :  { %s329_s13 = scalar_lea.hbm %s502_s0, 128 }
  0x16   :  { %p330_p8 = scmp.ne.s32.totalorder %s502_s0, %s329_s13  ;;  %p333_p9 = scmp.lt.u32.totalorder %s329_s13, %s502_s0 }
  0x18   :  { %p335_p10 = pnand %p333_p9, %p330_p8 }
  0x1a   :  { %338 = shalt.err (!%p335_p10)
}
  0x1b   :  { %s339_s1 = scalar_lea.vmem %s20_s8, 128  ;;  %p344_p12 = scmp.lt.s32.totalorder %s20_s8, %s20_s8 }
  0x1c   :  { %p340_p11 = scmp.ne.s32.totalorder %s20_s8, %s339_s1  ;;  %p345_p13 = scmp.lt.s32.totalorder %s339_s1, %s339_s1 }
  0x1e   :  { %p346_p0 = por %p345_p13, %p344_p12 }
  0x20   :  { %p347_p1 = pnand %p346_p0, %p340_p11 }
  0x22   :  { %350 = shalt.err (!%p347_p1)
}
  0x23   :  { %22 = dma.hbm_to_vmem [thread:$0]  %s502_s0, 128, %s20_s8, [#allocation3]  }
  0x24   :  { %s351_s22 = scalar_lea.hbm %s505_s3, 512 }
  0x25   :  { %p352_p2 = scmp.ne.s32.totalorder %s505_s3, %s351_s22  ;;  %p355_p3 = scmp.lt.u32.totalorder %s351_s22, %s505_s3 }
  0x27   :  { %p357_p4 = pnand %p355_p3, %p352_p2 }
  0x29   :  { %360 = shalt.err (!%p357_p4)
}
  0x2a   :  { %s361_s27 = scalar_lea.vmem %s43_s10, 512  ;;  %p366_p6 = scmp.lt.s32.totalorder %s43_s10, %s43_s10 }
  0x2b   :  { %p362_p5 = scmp.ne.s32.totalorder %s43_s10, %s361_s27  ;;  %p367_p7 = scmp.lt.s32.totalorder %s361_s27, %s361_s27 }
  0x2d   :  { %p368_p8 = por %p367_p7, %p366_p6 }
  0x2f   :  { %p369_p9 = pnand %p368_p8, %p362_p5 }
  0x31   :  { %372 = shalt.err (!%p369_p9)
}
  0x32   :  { %48 = dma.hbm_to_vmem [thread:$0]  %s505_s3, 512, %s43_s10, [#allocation6], %s402_s28, %s402_s28, %s403_s29  }
  0x33   :  { %395 = dma.done.wait [#allocation3], 128  }
  0x34   :  { %396 = vsyncadd [#allocation3], 4294967168 }
  0x35   :  { %397 = dma.done.wait [#allocation6], 1024  }
  0x36   :  { %398 = vsyncadd [#allocation6], 4294966272  ;;  %v406_v0 = vmov 0.0|0.0   ;;  %vm407_vm0 = vmmov 0   ;;  %v408_v1 = vmov 0.0   ;;  %v61_v2 = vld [vmem:[#allocation5] sm:$0xff] }
  0x37   :  { %284 = vmatprep.subr.bf16.mxu0 %v406_v0  ;;  %270 = vmatprep.mubr.msk.f32.mxu0 %vm407_vm0, %v408_v1  ;;  %v62_v3 = vld [vmem:[#allocation5 + $0x8] sm:$0xff]  ;;  %v63_v4 = vld [vmem:[#allocation5 + $0x10] sm:$0xff]  ;;  %v64_v6 = vld [vmem:[#allocation5 + $0x18] sm:$0xff]  ;;  %vm72_vm1 = vcmask 261120   ;;  %s409_s7 = smov [#allocation8]  }
  0x38   :  { %290 = vmatprep.subr.bf16.mxu1 %v406_v0  ;;  %281 = vmatprep.mubr.msk.f32.mxu1 %vm407_vm0, %v408_v1  ;;  %v285_v5 = vpack.c.bf16 %v62_v3, %v61_v2  ;;  %v288_v7 = vpack.c.bf16 %v64_v6, %v63_v4  ;;  %v60_v8 = vld [vmem:[#allocation2] sm:$0xff]  ;;  %v147_v9 = vld [vmem:[#allocation7] sm:$0xff]  ;;  %v148_v10 = vld [vmem:[#allocation7 + $0x8] sm:$0xff]  ;;  %s238_s8 = sshll.u32 %s409_s7, 4  ;;  %s239_s8 = int_to_ptr.vmem [resolvable:$true] %s238_s8 }
  0x39   :  { %v149_v11 = vld [vmem:[#allocation7 + $0x10] sm:$0xff]  ;;  %v291_v12 = vpack.c.bf16 %v148_v10, %v147_v9  ;;  %v150_v13 = vld [vmem:[#allocation7 + $0x18] sm:$0xff]  ;;  %s373_s9 = scalar_lea.vmem %s239_s8, 128  ;;  %p378_p11 = scmp.lt.s32.totalorder %s239_s8, %s239_s8 }
  0x3a   :  { %286 = vmatpush3.bf16.msra.mxu0 %v285_v5  ;;  %v294_v14 = vpack.c.bf16 %v150_v13, %v149_v11  ;;  %v248_v15 = vld [vmem:[%s504_s2] ss:$0 sm:$0xff]  ;;  %p374_p10 = scmp.ne.s32.totalorder %s239_s8, %s373_s9  ;;  %p379_p12 = scmp.lt.s32.totalorder %s373_s9, %s373_s9 }
  0x3b   :  { %287 = vmatprep.subr.bf16.mxu0 %v406_v0  ;;  %292 = vmatpush3.bf16.msra.mxu1 %v291_v12  ;;  %v250_v20 = vld [vmem:[%s506_s4] ss:$0 sm:$0xff] }
  0x3c   :  { %293 = vmatprep.subr.bf16.mxu1 %v406_v0  ;;  %p380_p13 = por %p379_p12, %p378_p11 }
  0x3e   :  { %289 = vmatpush3.bf16.msra.mxu0 %v288_v7  ;;  %p381_p0 = pnand %p380_p13, %p374_p10 }
  0x3f   :  { %295 = vmatpush3.bf16.msra.mxu1 %v294_v14 }
  0x41   :  { %271 = vmatmul.mubr.msk.f32.vlgmr.msra.gmra.mrb[0].mxu0 %vm72_vm1, %v60_v8 }
 0x114   :  { %v142_v16 = vpop.f32.mrb[0].mxu0 }
 0x115   :  { %v143_v17 = vadd.f32 %v248_v15, %v142_v16  ;;  %v272_v18 = vpop.f32.mrb[1].mxu0 }
 0x117   :  { %305 = vtanh.f32 %v143_v17 }
 0x121   :  { %v306_v19 = vpop.eup %305 }
 0x122   :  { %282 = vmatmul.mubr.msk.f32.vlgmr.msra.gmra.mrb[0].mxu1 %vm72_vm1, %v306_v19 }
 0x1f5   :  { %v227_v21 = vpop.f32.mrb[0].mxu1 }
 0x1f6   :  { %v228_v22 = vadd.f32 %v250_v20, %v227_v21  ;;  %v283_v23 = vpop.f32.mrb[1].mxu1 }
 0x1f8   :  { %231 = vst [vmem:[#allocation8] sm:$0xff] %v228_v22 }
 0x1f9   :  { %384 = shalt.err (!%p381_p0)
}
 0x1fa   :  { %s385_s11 = scalar_lea.hbm %s507_s5, 128 }
 0x1fb   :  { %p386_p1 = scmp.ne.s32.totalorder %s507_s5, %s385_s11  ;;  %p389_p2 = scmp.lt.u32.totalorder %s385_s11, %s507_s5 }
 0x1fd   :  { %p391_p3 = pnand %p389_p2, %p386_p1 }
 0x1ff   :  { %394 = shalt.err (!%p391_p3)
}
 0x200   :  { %241 = dma.vmem_to_hbm [thread:$0]  %s239_s8, 128, %s507_s5, [#allocation4]  }
 0x201   :  { %399 = dma.done.wait [#allocation4], 128  }
 0x202   :  { %400 = vsyncadd [#allocation4], 4294967168 }
 0x203   :  { %245 = vsyncpa [#allocation3], 1 }
 0x204   :  { %246 = vsyncpa [#allocation6], 1 }
 0x205   :  { %247 = vsyncpa [#allocation4], 1 }

</bundles_post_ra>
